<compile_context>
chip_gen: v6e
topology: v6e:2x2x1
jax: 0.10.0
libtpu: 0.0.40
codegen_flags: <defaults>
</compile_context>

<pallas_src>
import functools

import jax
import jax.numpy as jnp
from jax.experimental import pallas as pl
from jax.experimental.pallas import tpu as pltpu


def _dice_sums_kernel(p_ref, t_ref, inter_ref, psum_ref, tsum_ref, *,
                      threshold, spatial_size, chunk, chunks_per_group):
    g = pl.program_id(0)            # spatial group  -> "parallel" (megacore)
    k = pl.program_id(1)            # chunk in group -> innermost reduction axis

    @pl.when(k == 0)
    def _init():
        inter_ref[...] = jnp.zeros_like(inter_ref)
        psum_ref[...] = jnp.zeros_like(psum_ref)
        tsum_ref[...] = jnp.zeros_like(tsum_ref)

    c = g * chunks_per_group + k            # global spatial-chunk index
    remaining = spatial_size - c * chunk    # valid lanes in this chunk (may be <= 0)

    def accumulate(m, t_f):
        # m:   (B, N, TS) bool predicted-positive mask
        # t_f: (B, TS)    f32 targets (already column-masked on the cold path)
        t3 = t_f[:, None, :]                                   # broadcast over maps
        inter_ref[0] += jnp.sum(jnp.where(m, t3, 0.0), axis=-1, keepdims=True)
        psum_ref[0] += jnp.sum(jnp.where(m, 1.0, 0.0), axis=-1, keepdims=True)
        tsum_ref[0] += jnp.sum(t_f, axis=-1, keepdims=True)

    # Hot path: full chunk, zero masking overhead.
    @pl.when(remaining >= chunk)
    def _full_chunk():
        accumulate(p_ref[...] > threshold, t_ref[...].astype(jnp.float32))

    # Cold path (<= 1 per group): ragged last chunk or clamped duplicate chunk.
    @pl.when(remaining < chunk)
    def _ragged_chunk():
        p = p_ref[...]
        col_p = jax.lax.broadcasted_iota(jnp.int32, p.shape, p.ndim - 1)
        m = jnp.logical_and(p > threshold, col_p < remaining)
        col_t = jax.lax.broadcasted_iota(jnp.int32, t_ref.shape, 1)
        t_f = jnp.where(col_t < remaining, t_ref[...].astype(jnp.float32), 0.0)
        accumulate(m, t_f)


def _choose_chunk(S, B, N, p_itemsize, t_itemsize, block_bytes):
    """Pick the lane-chunk size TS, chunk count K, group count G and VMEM limit."""
    cdiv = lambda a, b: -(-a // b)
    rup = lambda a, b: cdiv(a, b) * b
    sub = lambda it: 8 * (4 // it)            # sublane tile rows: f32->8, bf16->16, i8->32
    # VMEM bytes per lane column, accounting for sublane padding of small B/N.
    p_rows = B * rup(N, sub(p_itemsize))
    t_rows = rup(B, sub(t_itemsize))
    per_col = p_rows * p_itemsize + t_rows * t_itemsize
    if S <= 128:
        TS = S                                # full spatial dim as the lane dim
    else:
        TS = max(128, min((block_bytes // per_col) // 128 * 128, (S // 128) * 128))
    K = cdiv(S, TS)
    G = 2 if K >= 2 else 1                    # 2 parallel groups feed both v7x cores
    K2 = cdiv(K, G)
    vmem = 2 * TS * per_col + (4 << 20)       # double-buffered streams + headroom
    return TS, K, G, K2, int(vmem)


def dice_loss(probs, targets, aggregate='mean', threshold=0.5, smooth=1e-6,
              block_bytes=10 * 1024 * 1024):
    """probs: (B, N, H, W[, D]); targets: (B, H, W[, D]). Matches torch DiceLoss."""
    assert aggregate in ['mean', 'min', 'max'] or aggregate is None

    # Stream native dtypes: keep bf16/f16/f32 probs as-is; targets stay 1-byte
    # when they arrive as bool/int8/uint8 (the f32 cast happens in-kernel).
    if probs.dtype not in (jnp.float32, jnp.bfloat16, jnp.float16):
        probs = probs.astype(jnp.float32)
    if targets.dtype == jnp.bool_:
        targets = targets.astype(jnp.int8)
    elif targets.dtype not in (jnp.float32, jnp.bfloat16, jnp.float16,
                               jnp.int8, jnp.uint8):
        targets = targets.astype(jnp.float32)

    B, N = probs.shape[0], probs.shape[1]
    S = 1
    for d in probs.shape[2:]:
        S *= d

    # Pure reshapes of the native contiguous layouts (no HBM copies, no pad).
    p = probs.reshape(B, N, S)
    t = targets.reshape(B, S)

    TS, K, G, K2, vmem = _choose_chunk(S, B, N, p.dtype.itemsize, t.dtype.itemsize,
                                       block_bytes)

    kernel = functools.partial(_dice_sums_kernel,
                               threshold=float(threshold),
                               spatial_size=S, chunk=TS, chunks_per_group=K2)

    inter, psum, tsum = pl.pallas_call(
        kernel,
        out_shape=(
            jax.ShapeDtypeStruct((G, B, N, 1), jnp.float32),   # intersection sums
            jax.ShapeDtypeStruct((G, B, N, 1), jnp.float32),   # predicted-positive sums
            jax.ShapeDtypeStruct((G, B, 1), jnp.float32),      # target sums
        ),
        grid_spec=pltpu.PrefetchScalarGridSpec(
            num_scalar_prefetch=0,
            grid=(G, K2),
            in_specs=[
                # Clamp the block index for the (<= G-1) duplicated tail chunks;
                # their contribution is masked to zero inside the kernel.
                pl.BlockSpec((B, N, TS),
                             lambda g, k: (0, 0, jnp.minimum(g * K2 + k, K - 1))),
                pl.BlockSpec((B, TS),
                             lambda g, k: (0, jnp.minimum(g * K2 + k, K - 1))),
            ],
            out_specs=[
                pl.BlockSpec((1, B, N, 1), lambda g, k: (g, 0, 0, 0)),
                pl.BlockSpec((1, B, N, 1), lambda g, k: (g, 0, 0, 0)),
                pl.BlockSpec((1, B, 1), lambda g, k: (g, 0, 0)),
            ],
        ),
        compiler_params=pltpu.CompilerParams(
            dimension_semantics=("parallel", "arbitrary"),
            vmem_limit_bytes=vmem,
        ),
    )(p, t)

    # Tiny cross-group reduction + dice math in plain JAX.
    inter = inter.sum(axis=0)[..., 0]          # (B, N)
    psum = psum.sum(axis=0)[..., 0]            # (B, N)
    tsum = tsum.sum(axis=0)                    # (B, 1)
    dice = ((2.0 * inter + smooth) / (psum + tsum + smooth)).T   # (N, B)

    if aggregate is None:
        return 1.0 - dice
    if aggregate == 'max':
        dice_best = jnp.max(dice, axis=0)
    elif aggregate == 'min':
        dice_best = jnp.min(dice, axis=0)
    else:
        dice_best = jnp.mean(dice, axis=0)
    return 1.0 - jnp.mean(dice_best)


def _dice_loss_ref(probs, targets, aggregate='mean', threshold=0.5, smooth=1e-6):
    """Pure-JAX reference mirroring the torch module."""
    probs = probs.astype(jnp.float32)
    targets = targets.astype(jnp.float32)
    probs = jnp.moveaxis(probs, 1, 0)                       # (N, B, ...)
    targets = jnp.broadcast_to(targets[None], probs.shape)  # (N, B, ...)
    spatial_dims = tuple(range(2, probs.ndim))
    probs = (probs > threshold).astype(jnp.float32)
    numerator = 2 * jnp.sum(probs * targets, axis=spatial_dims)
    denominator = jnp.sum(probs, axis=spatial_dims) + jnp.sum(targets, axis=spatial_dims)
    dice = (numerator + smooth) / (denominator + smooth)
    if aggregate is None:
        return 1 - dice
    if aggregate == 'max':
        dice_best = jnp.max(dice, axis=0)
    elif aggregate == 'min':
        dice_best = jnp.min(dice, axis=0)
    else:
        dice_best = jnp.mean(dice, axis=0)
    return 1 - jnp.mean(dice_best)


if __name__ == "__main__":
    key = jax.random.PRNGKey(0)
    k1, k2, k3, k4, k5, k6 = jax.random.split(key, 6)

    # Case 1: 5-D volumetric (B, N, H, W, D) f32 input, lane-aligned spatial size.
    B, N, H, W, D = 2, 4, 8, 8, 16
    probs = jax.random.uniform(k1, (B, N, H, W, D), dtype=jnp.float32)
    targets = (jax.random.uniform(k2, (B, H, W, D)) > 0.5).astype(jnp.float32)

    loss = jax.block_until_ready(dice_loss(probs, targets, aggregate='mean'))
    loss_ref = jax.block_until_ready(_dice_loss_ref(probs, targets, aggregate='mean'))
    assert jnp.allclose(loss, loss_ref, rtol=1e-5, atol=1e-6), (loss, loss_ref)

    d_k = jax.block_until_ready(dice_loss(probs, targets, aggregate=None))
    d_r = jax.block_until_ready(_dice_loss_ref(probs, targets, aggregate=None))
    assert jnp.allclose(d_k, d_r, rtol=1e-5, atol=1e-6)

    # Case 2: 4-D input with a tiny odd spatial size (block == full spatial dim).
    B2, N2, H2, W2 = 2, 3, 5, 7
    probs2 = jax.random.uniform(k3, (B2, N2, H2, W2), dtype=jnp.float32)
    targets2 = (jax.random.uniform(k4, (B2, H2, W2)) > 0.5).astype(jnp.float32)

    l2 = jax.block_until_ready(dice_loss(probs2, targets2, aggregate='min'))
    l2_ref = jax.block_until_ready(_dice_loss_ref(probs2, targets2, aggregate='min'))
    assert jnp.allclose(l2, l2_ref, rtol=1e-5, atol=1e-6), (l2, l2_ref)

    # Case 3: bf16 probs + int8 targets, B=1, non-aligned spatial size, and a
    # forced-small chunk so the multi-chunk / ragged-mask / parallel-group path
    # runs (no padding anywhere).
    B3, N3, H3, W3, D3 = 1, 2, 9, 13, 41      # S = 4797 (not a multiple of 128)
    probs3 = jax.random.uniform(k5, (B3, N3, H3, W3, D3)).astype(jnp.bfloat16)
    targets3 = (jax.random.uniform(k6, (B3, H3, W3, D3)) > 0.5).astype(jnp.int8)

    l3 = jax.block_until_ready(dice_loss(probs3, targets3, aggregate='mean',
                                         block_bytes=64 * 1024))
    l3_ref = jax.block_until_ready(_dice_loss_ref(probs3, targets3, aggregate='mean'))
    assert jnp.allclose(l3, l3_ref, rtol=1e-5, atol=1e-6), (l3, l3_ref)

    print("KERNEL_OK")
</pallas_src>

<mosaic_0001>
module attributes {stable_mosaic.version = 11 : i64} {
  func.func @_dice_sums_kernel(%arg0: i32, %arg1: i32, %arg2: memref<2x4x1024xf32, #tpu.memory_space<vmem>>, %arg3: memref<2x1024xf32, #tpu.memory_space<vmem>>, %arg4: memref<1x2x4x1xf32, #tpu.memory_space<vmem>>, %arg5: memref<1x2x4x1xf32, #tpu.memory_space<vmem>>, %arg6: memref<1x2x1xf32, #tpu.memory_space<vmem>>) attributes {dimension_semantics = [#tpu.dimension_semantics<parallel>, #tpu.dimension_semantics<arbitrary>], iteration_bounds = array<i64: 1, 1>, scalar_prefetch = 0 : i64, scratch_operands = 0 : i64, tpu.core_type = #tpu.core_type<tc>, window_params = [{transform_indices = @transform_0, window_bounds = array<i64: 2, 4, 1024>}, {transform_indices = @transform_1, window_bounds = array<i64: 2, 1024>}, {transform_indices = @transform_2, window_bounds = array<i64: 1, 2, 4, 1>}, {transform_indices = @transform_3, window_bounds = array<i64: 1, 2, 4, 1>}, {transform_indices = @transform_4, window_bounds = array<i64: 1, 2, 1>}]} {
    %c0_i32 = arith.constant 0 : i32
    %0 = arith.cmpi eq, %arg1, %c0_i32 : i32
    %1 = arith.extui %0 : i1 to i32
    %c0_i32_0 = arith.constant 0 : i32
    %2 = arith.cmpi ne, %1, %c0_i32_0 : i32
    scf.if %2 {
      %cst = arith.constant 0.000000e+00 : f32
      %13 = vector.broadcast %cst : f32 to vector<1x2x4x1xf32>
      %c0 = arith.constant 0 : index
      %c0_6 = arith.constant 0 : index
      %c0_7 = arith.constant 0 : index
      %c0_8 = arith.constant 0 : index
      %14 = vector.load %arg4[%c0, %c0_6, %c0_7, %c0_8] : memref<1x2x4x1xf32, #tpu.memory_space<vmem>>, vector<1x2x4x1xf32>
      tpu.vector_store %arg4[%c0, %c0_6, %c0_7, %c0_8], %13 {strides = array<i32>} : memref<1x2x4x1xf32, #tpu.memory_space<vmem>>, vector<1x2x4x1xf32>,
      %cst_9 = arith.constant 0.000000e+00 : f32
      %15 = vector.broadcast %cst_9 : f32 to vector<1x2x4x1xf32>
      %c0_10 = arith.constant 0 : index
      %c0_11 = arith.constant 0 : index
      %c0_12 = arith.constant 0 : index
      %c0_13 = arith.constant 0 : index
      %16 = vector.load %arg5[%c0_10, %c0_11, %c0_12, %c0_13] : memref<1x2x4x1xf32, #tpu.memory_space<vmem>>, vector<1x2x4x1xf32>
      tpu.vector_store %arg5[%c0_10, %c0_11, %c0_12, %c0_13], %15 {strides = array<i32>} : memref<1x2x4x1xf32, #tpu.memory_space<vmem>>, vector<1x2x4x1xf32>,
      %cst_14 = arith.constant 0.000000e+00 : f32
      %17 = vector.broadcast %cst_14 : f32 to vector<1x2x1xf32>
      %c0_15 = arith.constant 0 : index
      %c0_16 = arith.constant 0 : index
      %c0_17 = arith.constant 0 : index
      %18 = vector.load %arg6[%c0_15, %c0_16, %c0_17] : memref<1x2x1xf32, #tpu.memory_space<vmem>>, vector<1x2x1xf32>
      tpu.vector_store %arg6[%c0_15, %c0_16, %c0_17], %17 {strides = array<i32>} : memref<1x2x1xf32, #tpu.memory_space<vmem>>, vector<1x2x1xf32>,
    } else {
    }
    %c1_i32 = arith.constant 1 : i32
    %3 = arith.muli %arg0, %c1_i32 : i32
    %4 = arith.addi %3, %arg1 : i32
    %c1024_i32 = arith.constant 1024 : i32
    %5 = arith.muli %4, %c1024_i32 : i32
    %c1024_i32_1 = arith.constant 1024 : i32
    %6 = arith.subi %c1024_i32_1, %5 : i32
    %c1024_i32_2 = arith.constant 1024 : i32
    %7 = arith.cmpi sge, %6, %c1024_i32_2 : i32
    %8 = arith.extui %7 : i1 to i32
    %c0_i32_3 = arith.constant 0 : i32
    %9 = arith.cmpi ne, %8, %c0_i32_3 : i32
    scf.if %9 {
      %c0 = arith.constant 0 : index
      %c0_6 = arith.constant 0 : index
      %c0_7 = arith.constant 0 : index
      %13 = vector.load %arg2[%c0, %c0_6, %c0_7] : memref<2x4x1024xf32, #tpu.memory_space<vmem>>, vector<2x4x1024xf32>
      %cst = arith.constant 5.000000e-01 : f32
      %14 = vector.broadcast %cst : f32 to vector<2x4x1024xf32>
      %15 = arith.cmpf ogt, %13, %14 : vector<2x4x1024xf32>
      %c0_8 = arith.constant 0 : index
      %c0_9 = arith.constant 0 : index
      %16 = vector.load %arg3[%c0_8, %c0_9] : memref<2x1024xf32, #tpu.memory_space<vmem>>, vector<2x1024xf32>
      %17 = vector.shape_cast %16 : vector<2x1024xf32> to vector<2x1x1024xf32>
      %c0_10 = arith.constant 0 : index
      %c0_11 = arith.constant 0 : index
      %c0_12 = arith.constant 0 : index
      %c0_13 = arith.constant 0 : index
      %18 = vector.load %arg4[%c0_10, %c0_11, %c0_12, %c0_13] : memref<1x2x4x1xf32, #tpu.memory_space<vmem>>, vector<1x2x4x1xf32>
      %19 = vector.shape_cast %18 : vector<1x2x4x1xf32> to vector<2x4x1xf32>
      %cst_14 = arith.constant 0.000000e+00 : f32
      %20 = vector.shape_cast %17 : vector<2x1x1024xf32> to vector<2x1x1024xf32>
      %21 = vector.broadcast %20 : vector<2x1x1024xf32> to vector<2x4x1024xf32>
      %22 = vector.broadcast %cst_14 : f32 to vector<2x4x1024xf32>
      %23 = arith.select %15, %21, %22 : vector<2x4x1024xi1>, vector<2x4x1024xf32>
      %cst_15 = arith.constant dense<0.000000e+00> : vector<2x4xf32>
      %24 = vector.multi_reduction <add>, %23, %cst_15 [2] : vector<2x4x1024xf32> to vector<2x4xf32>
      %25 = vector.shape_cast %24 : vector<2x4xf32> to vector<2x4x1xf32>
      %26 = arith.addf %19, %25 : vector<2x4x1xf32>
      %c0_16 = arith.constant 0 : index
      %c0_17 = arith.constant 0 : index
      %c0_18 = arith.constant 0 : index
      %c0_19 = arith.constant 0 : index
      %27 = vector.load %arg4[%c0_16, %c0_17, %c0_18, %c0_19] : memref<1x2x4x1xf32, #tpu.memory_space<vmem>>, vector<1x2x4x1xf32>
      %28 = vector.shape_cast %27 : vector<1x2x4x1xf32> to vector<2x4x1xf32>
      %29 = vector.shape_cast %26 : vector<2x4x1xf32> to vector<1x2x4x1xf32>
      tpu.vector_store %arg4[%c0_16, %c0_17, %c0_18, %c0_19], %29 {strides = array<i32>} : memref<1x2x4x1xf32, #tpu.memory_space<vmem>>, vector<1x2x4x1xf32>,
      %c0_20 = arith.constant 0 : index
      %c0_21 = arith.constant 0 : index
      %c0_22 = arith.constant 0 : index
      %c0_23 = arith.constant 0 : index
      %30 = vector.load %arg5[%c0_20, %c0_21, %c0_22, %c0_23] : memref<1x2x4x1xf32, #tpu.memory_space<vmem>>, vector<1x2x4x1xf32>
      %31 = vector.shape_cast %30 : vector<1x2x4x1xf32> to vector<2x4x1xf32>
      %cst_24 = arith.constant 1.000000e+00 : f32
      %cst_25 = arith.constant 0.000000e+00 : f32
      %32 = vector.broadcast %cst_24 : f32 to vector<2x4x1024xf32>
      %33 = vector.broadcast %cst_25 : f32 to vector<2x4x1024xf32>
      %34 = arith.select %15, %32, %33 : vector<2x4x1024xi1>, vector<2x4x1024xf32>
      %cst_26 = arith.constant dense<0.000000e+00> : vector<2x4xf32>
      %35 = vector.multi_reduction <add>, %34, %cst_26 [2] : vector<2x4x1024xf32> to vector<2x4xf32>
      %36 = vector.shape_cast %35 : vector<2x4xf32> to vector<2x4x1xf32>
      %37 = arith.addf %31, %36 : vector<2x4x1xf32>
      %c0_27 = arith.constant 0 : index
      %c0_28 = arith.constant 0 : index
      %c0_29 = arith.constant 0 : index
      %c0_30 = arith.constant 0 : index
      %38 = vector.load %arg5[%c0_27, %c0_28, %c0_29, %c0_30] : memref<1x2x4x1xf32, #tpu.memory_space<vmem>>, vector<1x2x4x1xf32>
      %39 = vector.shape_cast %38 : vector<1x2x4x1xf32> to vector<2x4x1xf32>
      %40 = vector.shape_cast %37 : vector<2x4x1xf32> to vector<1x2x4x1xf32>
      tpu.vector_store %arg5[%c0_27, %c0_28, %c0_29, %c0_30], %40 {strides = array<i32>} : memref<1x2x4x1xf32, #tpu.memory_space<vmem>>, vector<1x2x4x1xf32>,
      %c0_31 = arith.constant 0 : index
      %c0_32 = arith.constant 0 : index
      %c0_33 = arith.constant 0 : index
      %41 = vector.load %arg6[%c0_31, %c0_32, %c0_33] : memref<1x2x1xf32, #tpu.memory_space<vmem>>, vector<1x2x1xf32>
      %42 = vector.shape_cast %41 : vector<1x2x1xf32> to vector<2x1xf32>
      %cst_34 = arith.constant dense<0.000000e+00> : vector<2xf32>
      %43 = vector.multi_reduction <add>, %16, %cst_34 [1] : vector<2x1024xf32> to vector<2xf32>
      %44 = vector.shape_cast %43 : vector<2xf32> to vector<2x1xf32>
      %45 = arith.addf %42, %44 : vector<2x1xf32>
      %c0_35 = arith.constant 0 : index
      %c0_36 = arith.constant 0 : index
      %c0_37 = arith.constant 0 : index
      %46 = vector.load %arg6[%c0_35, %c0_36, %c0_37] : memref<1x2x1xf32, #tpu.memory_space<vmem>>, vector<1x2x1xf32>
      %47 = vector.shape_cast %46 : vector<1x2x1xf32> to vector<2x1xf32>
      %48 = vector.shape_cast %45 : vector<2x1xf32> to vector<1x2x1xf32>
      tpu.vector_store %arg6[%c0_35, %c0_36, %c0_37], %48 {strides = array<i32>} : memref<1x2x1xf32, #tpu.memory_space<vmem>>, vector<1x2x1xf32>,
    } else {
    }
    %c1024_i32_4 = arith.constant 1024 : i32
    %10 = arith.cmpi slt, %6, %c1024_i32_4 : i32
    %11 = arith.extui %10 : i1 to i32
    %c0_i32_5 = arith.constant 0 : i32
    %12 = arith.cmpi ne, %11, %c0_i32_5 : i32
    scf.if %12 {
      %c0 = arith.constant 0 : index
      %c0_6 = arith.constant 0 : index
      %c0_7 = arith.constant 0 : index
      %13 = vector.load %arg2[%c0, %c0_6, %c0_7] : memref<2x4x1024xf32, #tpu.memory_space<vmem>>, vector<2x4x1024xf32>
      %14 = tpu.iota {dimensions = array<i32: 2>} : vector<2x4x1024xi32>
      %cst = arith.constant 5.000000e-01 : f32
      %15 = vector.broadcast %cst : f32 to vector<2x4x1024xf32>
      %16 = arith.cmpf ogt, %13, %15 : vector<2x4x1024xf32>
      %17 = vector.broadcast %6 : i32 to vector<2x4x1024xi32>
      %18 = arith.cmpi slt, %14, %17 : vector<2x4x1024xi32>
      %19 = arith.andi %16, %18 : vector<2x4x1024xi1>
      %20 = tpu.iota {dimensions = array<i32: 1>} : vector<2x1024xi32>
      %21 = vector.broadcast %6 : i32 to vector<2x1024xi32>
      %22 = arith.cmpi slt, %20, %21 : vector<2x1024xi32>
      %c0_8 = arith.constant 0 : index
      %c0_9 = arith.constant 0 : index
      %23 = vector.load %arg3[%c0_8, %c0_9] : memref<2x1024xf32, #tpu.memory_space<vmem>>, vector<2x1024xf32>
      %cst_10 = arith.constant 0.000000e+00 : f32
      %24 = vector.broadcast %cst_10 : f32 to vector<2x1024xf32>
      %25 = arith.select %22, %23, %24 : vector<2x1024xi1>, vector<2x1024xf32>
      %26 = vector.shape_cast %25 : vector<2x1024xf32> to vector<2x1x1024xf32>
      %c0_11 = arith.constant 0 : index
      %c0_12 = arith.constant 0 : index
      %c0_13 = arith.constant 0 : index
      %c0_14 = arith.constant 0 : index
      %27 = vector.load %arg4[%c0_11, %c0_12, %c0_13, %c0_14] : memref<1x2x4x1xf32, #tpu.memory_space<vmem>>, vector<1x2x4x1xf32>
      %28 = vector.shape_cast %27 : vector<1x2x4x1xf32> to vector<2x4x1xf32>
      %cst_15 = arith.constant 0.000000e+00 : f32
      %29 = vector.shape_cast %26 : vector<2x1x1024xf32> to vector<2x1x1024xf32>
      %30 = vector.broadcast %29 : vector<2x1x1024xf32> to vector<2x4x1024xf32>
      %31 = vector.broadcast %cst_15 : f32 to vector<2x4x1024xf32>
      %32 = arith.select %19, %30, %31 : vector<2x4x1024xi1>, vector<2x4x1024xf32>
      %cst_16 = arith.constant dense<0.000000e+00> : vector<2x4xf32>
      %33 = vector.multi_reduction <add>, %32, %cst_16 [2] : vector<2x4x1024xf32> to vector<2x4xf32>
      %34 = vector.shape_cast %33 : vector<2x4xf32> to vector<2x4x1xf32>
      %35 = arith.addf %28, %34 : vector<2x4x1xf32>
      %c0_17 = arith.constant 0 : index
      %c0_18 = arith.constant 0 : index
      %c0_19 = arith.constant 0 : index
      %c0_20 = arith.constant 0 : index
      %36 = vector.load %arg4[%c0_17, %c0_18, %c0_19, %c0_20] : memref<1x2x4x1xf32, #tpu.memory_space<vmem>>, vector<1x2x4x1xf32>
      %37 = vector.shape_cast %36 : vector<1x2x4x1xf32> to vector<2x4x1xf32>
      %38 = vector.shape_cast %35 : vector<2x4x1xf32> to vector<1x2x4x1xf32>
      tpu.vector_store %arg4[%c0_17, %c0_18, %c0_19, %c0_20], %38 {strides = array<i32>} : memref<1x2x4x1xf32, #tpu.memory_space<vmem>>, vector<1x2x4x1xf32>,
      %c0_21 = arith.constant 0 : index
      %c0_22 = arith.constant 0 : index
      %c0_23 = arith.constant 0 : index
      %c0_24 = arith.constant 0 : index
      %39 = vector.load %arg5[%c0_21, %c0_22, %c0_23, %c0_24] : memref<1x2x4x1xf32, #tpu.memory_space<vmem>>, vector<1x2x4x1xf32>
      %40 = vector.shape_cast %39 : vector<1x2x4x1xf32> to vector<2x4x1xf32>
      %cst_25 = arith.constant 1.000000e+00 : f32
      %cst_26 = arith.constant 0.000000e+00 : f32
      %41 = vector.broadcast %cst_25 : f32 to vector<2x4x1024xf32>
      %42 = vector.broadcast %cst_26 : f32 to vector<2x4x1024xf32>
      %43 = arith.select %19, %41, %42 : vector<2x4x1024xi1>, vector<2x4x1024xf32>
      %cst_27 = arith.constant dense<0.000000e+00> : vector<2x4xf32>
      %44 = vector.multi_reduction <add>, %43, %cst_27 [2] : vector<2x4x1024xf32> to vector<2x4xf32>
      %45 = vector.shape_cast %44 : vector<2x4xf32> to vector<2x4x1xf32>
      %46 = arith.addf %40, %45 : vector<2x4x1xf32>
      %c0_28 = arith.constant 0 : index
      %c0_29 = arith.constant 0 : index
      %c0_30 = arith.constant 0 : index
      %c0_31 = arith.constant 0 : index
      %47 = vector.load %arg5[%c0_28, %c0_29, %c0_30, %c0_31] : memref<1x2x4x1xf32, #tpu.memory_space<vmem>>, vector<1x2x4x1xf32>
      %48 = vector.shape_cast %47 : vector<1x2x4x1xf32> to vector<2x4x1xf32>
      %49 = vector.shape_cast %46 : vector<2x4x1xf32> to vector<1x2x4x1xf32>
      tpu.vector_store %arg5[%c0_28, %c0_29, %c0_30, %c0_31], %49 {strides = array<i32>} : memref<1x2x4x1xf32, #tpu.memory_space<vmem>>, vector<1x2x4x1xf32>,
      %c0_32 = arith.constant 0 : index
      %c0_33 = arith.constant 0 : index
      %c0_34 = arith.constant 0 : index
      %50 = vector.load %arg6[%c0_32, %c0_33, %c0_34] : memref<1x2x1xf32, #tpu.memory_space<vmem>>, vector<1x2x1xf32>
      %51 = vector.shape_cast %50 : vector<1x2x1xf32> to vector<2x1xf32>
      %cst_35 = arith.constant dense<0.000000e+00> : vector<2xf32>
      %52 = vector.multi_reduction <add>, %25, %cst_35 [1] : vector<2x1024xf32> to vector<2xf32>
      %53 = vector.shape_cast %52 : vector<2xf32> to vector<2x1xf32>
      %54 = arith.addf %51, %53 : vector<2x1xf32>
      %c0_36 = arith.constant 0 : index
      %c0_37 = arith.constant 0 : index
      %c0_38 = arith.constant 0 : index
      %55 = vector.load %arg6[%c0_36, %c0_37, %c0_38] : memref<1x2x1xf32, #tpu.memory_space<vmem>>, vector<1x2x1xf32>
      %56 = vector.shape_cast %55 : vector<1x2x1xf32> to vector<2x1xf32>
      %57 = vector.shape_cast %54 : vector<2x1xf32> to vector<1x2x1xf32>
      tpu.vector_store %arg6[%c0_36, %c0_37, %c0_38], %57 {strides = array<i32>} : memref<1x2x1xf32, #tpu.memory_space<vmem>>, vector<1x2x1xf32>,
    } else {
    }
    return
  }
  func.func @transform_0(%arg0: i32, %arg1: i32) -> (i32, i32, i32) {
    %c1_i32 = arith.constant 1 : i32
    %0 = arith.muli %arg0, %c1_i32 : i32
    %1 = arith.addi %0, %arg1 : i32
    %c0_i32 = arith.constant 0 : i32
    %2 = arith.minsi %1, %c0_i32 : i32
    %c0_i32_0 = arith.constant 0 : i32
    %c0_i32_1 = arith.constant 0 : i32
    %c0_i32_2 = arith.constant 0 : i32
    return %c0_i32_0, %c0_i32_1, %2 : i32, i32, i32
  }
  func.func @transform_1(%arg0: i32, %arg1: i32) -> (i32, i32) {
    %c1_i32 = arith.constant 1 : i32
    %0 = arith.muli %arg0, %c1_i32 : i32
    %1 = arith.addi %0, %arg1 : i32
    %c0_i32 = arith.constant 0 : i32
    %2 = arith.minsi %1, %c0_i32 : i32
    %c0_i32_0 = arith.constant 0 : i32
    %c0_i32_1 = arith.constant 0 : i32
    return %c0_i32_0, %2 : i32, i32
  }
  func.func @transform_2(%arg0: i32, %arg1: i32) -> (i32, i32, i32, i32) {
    %c0_i32 = arith.constant 0 : i32
    %c0_i32_0 = arith.constant 0 : i32
    %c0_i32_1 = arith.constant 0 : i32
    %c0_i32_2 = arith.constant 0 : i32
    return %arg0, %c0_i32, %c0_i32_0, %c0_i32_1 : i32, i32, i32, i32
  }
  func.func @transform_3(%arg0: i32, %arg1: i32) -> (i32, i32, i32, i32) {
    %c0_i32 = arith.constant 0 : i32
    %c0_i32_0 = arith.constant 0 : i32
    %c0_i32_1 = arith.constant 0 : i32
    %c0_i32_2 = arith.constant 0 : i32
    return %arg0, %c0_i32, %c0_i32_0, %c0_i32_1 : i32, i32, i32, i32
  }
  func.func @transform_4(%arg0: i32, %arg1: i32) -> (i32, i32, i32) {
    %c0_i32 = arith.constant 0 : i32
    %c0_i32_0 = arith.constant 0 : i32
    %c0_i32_1 = arith.constant 0 : i32
    return %arg0, %c0_i32, %c0_i32_0 : i32, i32, i32
  }
}

</mosaic_0001>

<bundles_post_ra>
// kernel: tpu_custom_call.1
= control target key start
LH: loop header
LB: loop body
LE: loop exit
PB: predicated region body
PF: predicated region fallthrough
CT: control target
= control target key end

     0   :  { %10 = vsyncpa [#allocation3], 0  ;;  %s1134_s0 = inlined_call_operand.hbm [shape: f32[2,4,1024], index: 0, kind: input, shape index: {}]   ;;  %s1135_s1 = inlined_call_operand.hbm [shape: f32[2,1024], index: 1, kind: input, shape index: {}]   ;;  %s1136_s2 = inlined_call_operand.vmem [shape: f32[1,2,4,1], index: 2, kind: output, shape index: {0}]   ;;  %s1137_s3 = inlined_call_operand.vmem [shape: f32[1,2,4,1], index: 3, kind: output, shape index: {1}]   ;;  %s1138_s4 = inlined_call_operand.vmem [shape: f32[1,2,1], index: 4, kind: output, shape index: {2}]  }
   0x1   :  { %11 = vsyncpa [#allocation5], 0  ;;  %s913_s15 = smov [#allocation2]  }
   0x2   :  { %s23_s16 = sshll.u32 %s913_s15, 4  ;;  %s24_s16 = int_to_ptr.vmem [resolvable:$true] %s23_s16 }
   0x3   :  { %s877_s17 = scalar_lea.vmem %s24_s16, 1024  ;;  %p882_p1 = scmp.lt.s32.totalorder %s24_s16, %s24_s16 }
   0x4   :  { %p878_p0 = scmp.ne.s32.totalorder %s24_s16, %s877_s17  ;;  %p883_p2 = scmp.lt.s32.totalorder %s877_s17, %s877_s17 }
   0x6   :  { %p884_p3 = por %p883_p2, %p882_p1 }
   0x8   :  { %p885_p4 = pnand %p884_p3, %p878_p0 }
   0xa   :  { %888 = shalt.err (!%p885_p4)
}
   0xb   :  { %s914_s18 = smov 512   ;;  %s915_s19 = smov 32  }
   0xc   :  { %29 = dma.hbm_to_vmem [thread:$0]  %s1134_s0, 1024, %s24_s16, [#allocation3], %s914_s18, %s914_s18, %s915_s19  }
   0xd   :  { %s916_s22 = smov [#allocation4]  }
   0xe   :  { %s42_s23 = sshll.u32 %s916_s22, 4  ;;  %s43_s23 = int_to_ptr.vmem [resolvable:$true] %s42_s23 }
   0xf   :  { %s897_s24 = scalar_lea.vmem %s43_s23, 256  ;;  %p902_p6 = scmp.lt.s32.totalorder %s43_s23, %s43_s23 }
  0x10   :  { %p898_p5 = scmp.ne.s32.totalorder %s43_s23, %s897_s24  ;;  %p903_p7 = scmp.lt.s32.totalorder %s897_s24, %s897_s24 }
  0x12   :  { %p904_p8 = por %p903_p7, %p902_p6 }
  0x14   :  { %p905_p9 = pnand %p904_p8, %p898_p5 }
  0x16   :  { %908 = shalt.err (!%p905_p9)
}
  0x17   :  { %45 = dma.hbm_to_vmem [thread:$0]  %s1135_s1, 256, %s43_s23, [#allocation5]  }
  0x18   :  { %909 = dma.done.wait [#allocation3], 1024  }
  0x19   :  { %910 = vsyncadd [#allocation3], 4294966272 }
  0x1a   :  { %911 = dma.done.wait [#allocation5], 256  }
  0x1b   :  { %912 = vsyncadd [#allocation5], 4294967040  ;;  %v101_v0 = vlaneseq  ;;  %v917_v1 = vmov 1966171168   ;;  %vm64_vm0 = vcmask 3072   ;;  %v918_v4 = vmov 0.0  }
  0x1c   :  { %v99_v2 = vunpack.c.l.s4 %v917_v1  ;;  %65 = vst.msk [vmem:[%s1136_s2] sm:$0xf] %vm64_vm0, %v918_v4  ;;  %66 = vst.msk [vmem:[%s1136_s2 + $0x4] sm:$0xf] %vm64_vm0, %v918_v4  ;;  %vm228_vm1 = vcmask 1043456   ;;  %v78_v10 = vld [vmem:[#allocation2] sm:$0xff] }
  0x1d   :  { %v951_v3 = vshrl.u32 %v101_v0, 7  ;;  %67 = vst.msk [vmem:[%s1137_s3] sm:$0xf] %vm64_vm0, %v918_v4  ;;  %68 = vst.msk [vmem:[%s1137_s3 + $0x4] sm:$0xf] %vm64_vm0, %v918_v4  ;;  %v79_v11 = vld [vmem:[#allocation2 + $0x8] sm:$0xff] }
  0x1e   :  { %v100_v5 = vunpack.c.0.s8 %v99_v2  ;;  %v80_v12 = vld [vmem:[#allocation2 + $0x10] sm:$0xff]  ;;  %v81_v16 = vld [vmem:[#allocation2 + $0x18] sm:$0xff]  ;;  %vm86_vm2 = vcmp.gt.f32.partialorder %v78_v10, 0.5  ;;  %v980_v17 = vld [vmem:[#allocation4] sm:$0xff]  ;;  %vm87_vm3 = vcmp.gt.f32.partialorder %v79_v11, 0.5  ;;  %vm383_vm10 = vcmask 1041408  }
  0x1f   :  { %v118_v7 = vsub.s32 0, %v951_v3  ;;  %v122_v8 = vsub.s32 1, %v951_v3  ;;  %v126_v9 = vsub.s32 2, %v951_v3  ;;  %v130_v13 = vsub.s32 3, %v951_v3  ;;  %v982_v18 = vld [vmem:[#allocation4 + $0x8] sm:$0xff]  ;;  %v82_v2 = vld [vmem:[#allocation2 + $0x20] sm:$0xff] }
  0x20   :  { %v103_v6 = vsub.s32 %v100_v5, %v951_v3  ;;  %v134_v14 = vsub.s32 4, %v951_v3  ;;  %v138_v15 = vsub.s32 5, %v951_v3  ;;  %v142_v19 = vsub.s32 6, %v951_v3 }
  0x21   :  { %v146_v20 = vsub.s32 7, %v951_v3  ;;  %v270_v23 = vsel %vm86_vm2, 1.0, %v918_v4  ;;  %vm88_vm4 = vcmp.gt.f32.partialorder %v80_v12, 0.5  ;;  %vm89_vm5 = vcmp.gt.f32.partialorder %v81_v16, 0.5  ;;  %v83_v12 = vld [vmem:[#allocation2 + $0x28] sm:$0xff]  ;;  %v84_v16 = vld [vmem:[#allocation2 + $0x30] sm:$0xff] }
  0x22   :  { %v104_v21 = vrot.slane %v980_v17, %v103_v6  ;;  %v111_v22 = vrot.slane %v982_v18, %v103_v6  ;;  %v271_v24 = vsel %vm87_vm3, 1.0, %v918_v4  ;;  %v286_v25 = vcombine.high %v270_v23, %v270_v23 }
  0x23   :  { %v272_v27 = vsel %vm88_vm4, 1.0, %v918_v4  ;;  %v273_v28 = vsel %vm89_vm5, 1.0, %v918_v4  ;;  %v287_v29 = vcombine.high %v271_v24, %v271_v24  ;;  %v302_v30 = vsel %vm228_vm1, %v270_v23, 0.0  ;;  %v85_v23 = vld [vmem:[#allocation2 + $0x38] sm:$0xff] }
  0x24   :  { %v112_v26 = vcombine.low %v104_v21, %v111_v22  ;;  %v303_v31 = vsel %vm228_vm1, %v286_v25, 0.0  ;;  %v305_v32 = vsel %vm228_vm1, %v271_v24, 0.0  ;;  %v919_v44 = vmov 1983009808  }
  0x25   :  { %v304_v43 = vadd.f32 %v303_v31, %v302_v30  ;;  %v1015_v45 = vunpack.c.l.s4 %v919_v44  ;;  %v288_v48 = vcombine.high %v272_v27, %v272_v27  ;;  %v289_v49 = vcombine.high %v273_v28, %v273_v28 }
  0x26   :  { %v119_v33 = vrot.slane %v112_v26, %v118_v7  ;;  %v123_v34 = vrot.slane %v112_v26, %v122_v8  ;;  %v127_v35 = vrot.slane %v112_v26, %v126_v9  ;;  %v131_v36 = vrot.slane %v112_v26, %v130_v13 }
  0x27   :  { %v135_v37 = vrot.slane %v112_v26, %v134_v14  ;;  %v139_v38 = vrot.slane %v112_v26, %v138_v15  ;;  %v143_v39 = vrot.slane %v112_v26, %v142_v19  ;;  %v147_v40 = vrot.slane %v112_v26, %v146_v20 }
  0x28   :  { %v180_v41 = vcombine.low %v119_v33, %v123_v34  ;;  %v181_v42 = vcombine.low %v127_v35, %v131_v36  ;;  %v306_v52 = vadd.f32 %v305_v32, %v304_v43  ;;  %v307_v53 = vsel %vm228_vm1, %v287_v29, 0.0 }
  0x29   :  { %v182_v46 = vcombine.low %v135_v37, %v139_v38  ;;  %v183_v47 = vcombine.low %v143_v39, %v147_v40  ;;  %v344_v61 = vunpack.c.0.s8 %v1015_v45  ;;  %v309_v0 = vsel %vm228_vm1, %v272_v27, 0.0 }
  0x2a   :  { %v196_v50 = vsel %vm86_vm2, %v180_v41, 0.0  ;;  %v197_v51 = vsel %vm87_vm3, %v181_v42, 0.0  ;;  %v311_v1 = vsel %vm228_vm1, %v288_v48, 0.0  ;;  %v308_v6 = vadd.f32 %v307_v53, %v306_v52 }
  0x2b   :  { %v198_v54 = vsel %vm88_vm4, %v182_v46, 0.0  ;;  %v199_v55 = vsel %vm89_vm5, %v183_v47, 0.0  ;;  %v212_v56 = vcombine.high %v196_v50, %v196_v50  ;;  %v213_v57 = vcombine.high %v197_v51, %v197_v51 }
  0x2c   :  { %v214_v58 = vcombine.high %v198_v54, %v198_v54  ;;  %v215_v59 = vcombine.high %v199_v55, %v199_v55  ;;  %v229_v60 = vsel %vm228_vm1, %v196_v50, 0.0  ;;  %v232_v63 = vsel %vm228_vm1, %v197_v51, 0.0 }
  0x2d   :  { %v230_v62 = vsel %vm228_vm1, %v212_v56, 0.0  ;;  %v313_v10 = vsel %vm228_vm1, %v273_v28, 0.0  ;;  %v315_v11 = vsel %vm228_vm1, %v289_v49, 0.0  ;;  %v234_v24 = vsel %vm228_vm1, %v213_v57, 0.0 }
  0x2e   :  { %v231_v5 = vadd.f32 %v230_v62, %v229_v60  ;;  %v236_v25 = vsel %vm228_vm1, %v198_v54, 0.0  ;;  %v238_v26 = vsel %vm228_vm1, %v214_v58, 0.0  ;;  %v240_v27 = vsel %vm228_vm1, %v199_v55, 0.0 }
  0x2f   :  { %v242_v30 = vsel %vm228_vm1, %v215_v59, 0.0  ;;  %v310_v31 = vadd.f32 %v309_v0, %v308_v6  ;;  %v113_v32 = vcombine.high %v104_v21, %v111_v22  ;;  %vm90_vm6 = vcmp.gt.f32.partialorder %v82_v2, 0.5 }
  0x30   :  { %v233_v29 = vadd.f32 %v232_v63, %v231_v5  ;;  %vm91_vm7 = vcmp.gt.f32.partialorder %v83_v12, 0.5  ;;  %vm92_vm8 = vcmp.gt.f32.partialorder %v84_v16, 0.5  ;;  %vm93_vm9 = vcmp.gt.f32.partialorder %v85_v23, 0.5 }
  0x31   :  { %v312_v33 = vadd.f32 %v311_v1, %v310_v31  ;;  %v151_v34 = vrot.slane %v113_v32, %v118_v7  ;;  %v155_v35 = vrot.slane %v113_v32, %v122_v8  ;;  %v159_v36 = vrot.slane %v113_v32, %v126_v9 }
  0x32   :  { %v235_v28 = vadd.f32 %v234_v24, %v233_v29  ;;  %v163_v37 = vrot.slane %v113_v32, %v130_v13  ;;  %v167_v21 = vrot.slane %v113_v32, %v134_v14  ;;  %v171_v22 = vrot.slane %v113_v32, %v138_v15 }
  0x33   :  { %v314_v39 = vadd.f32 %v313_v10, %v312_v33  ;;  %v175_v7 = vrot.slane %v113_v32, %v142_v19  ;;  %v179_v8 = vrot.slane %v113_v32, %v146_v20  ;;  %v184_v40 = vcombine.low %v151_v34, %v155_v35 }
  0x34   :  { %v237_v38 = vadd.f32 %v236_v25, %v235_v28  ;;  %v185_v41 = vcombine.low %v159_v36, %v163_v37  ;;  %v186_v9 = vcombine.low %v167_v21, %v171_v22  ;;  %v274_v13 = vsel %vm90_vm6, 1.0, %v918_v4 }
  0x35   :  { %v316_v43 = vadd.f32 %v315_v11, %v314_v39  ;;  %v187_v14 = vcombine.low %v175_v7, %v179_v8  ;;  %v275_v15 = vsel %vm91_vm7, 1.0, %v918_v4  ;;  %v200_v44 = vsel %vm90_vm6, %v184_v40, 0.0 }
  0x36   :  { %v239_v42 = vadd.f32 %v238_v26, %v237_v38  ;;  %v201_v45 = vsel %vm91_vm7, %v185_v41, 0.0  ;;  %v202_v19 = vsel %vm92_vm8, %v186_v9, 0.0  ;;  %v276_v20 = vsel %vm92_vm8, 1.0, %v918_v4 }
  0x37   :  { %317 = vadd.xlane.f32.xlu1 %v316_v43  ;;  %v216_v47 = vcombine.high %v200_v44, %v200_v44  ;;  %v217_v48 = vcombine.high %v201_v45, %v201_v45  ;;  %v290_v49 = vcombine.high %v274_v13, %v274_v13  ;;  %v203_v50 = vsel %vm93_vm9, %v187_v14, 0.0 }
  0x38   :  { %v241_v46 = vadd.f32 %v240_v27, %v239_v42  ;;  %v246_v51 = vsel %vm228_vm1, %v200_v44, 0.0  ;;  %v291_v52 = vcombine.high %v275_v15, %v275_v15  ;;  %v347_v53 = vsub.s32 %v344_v61, %v951_v3 }
  0x39   :  { %v218_v55 = vcombine.high %v202_v19, %v202_v19  ;;  %v247_v56 = vsel %vm228_vm1, %v216_v47, 0.0  ;;  %v249_v57 = vsel %vm228_vm1, %v201_v45, 0.0  ;;  %v277_v59 = vsel %vm93_vm9, 1.0, %v918_v4 }
  0x3a   :  { %v243_v54 = vadd.f32 %v242_v30, %v241_v46  ;;  %v248_v58 = vadd.f32 %v247_v56, %v246_v51  ;;  %v292_v60 = vcombine.high %v276_v20, %v276_v20  ;;  %v251_v62 = vsel %vm228_vm1, %v217_v48, 0.0  ;;  %v268_v51 = vld [vmem:[%s1137_s3] sm:$0xf] }
  0x3b   :  { %v319_v63 = vsel %vm228_vm1, %v274_v13, 0.0  ;;  %v320_v0 = vsel %vm228_vm1, %v290_v49, 0.0  ;;  %v322_v3 = vsel %vm228_vm1, %v275_v15, 0.0  ;;  %v219_v61 = vcombine.high %v203_v50, %v203_v50 }
  0x3c   :  { %244 = vadd.xlane.f32.xlu0 %v243_v54  ;;  %v250_v1 = vadd.f32 %v249_v57, %v248_v58  ;;  %v253_v2 = vsel %vm228_vm1, %v202_v19, 0.0  ;;  %v321_v5 = vadd.f32 %v320_v0, %v319_v63  ;;  %v255_v6 = vsel %vm228_vm1, %v218_v55, 0.0  ;;  %v114_v54 = vld [vmem:[%s1136_s2] sm:$0xf]  ;;  %v269_v58 = vld [vmem:[%s1137_s3 + $0x4] sm:$0xf] }
  0x3d   :  { %v324_v10 = vsel %vm228_vm1, %v291_v52, 0.0  ;;  %v341_v11 = vcombine.high %v980_v17, %v980_v17  ;;  %v348_v12 = vrot.slane %v980_v17, %v347_v53  ;;  %v326_v24 = vsel %vm228_vm1, %v276_v20, 0.0 }
  0x3e   :  { %v252_v16 = vadd.f32 %v251_v62, %v250_v1  ;;  %v323_v23 = vadd.f32 %v322_v3, %v321_v5  ;;  %v358_v25 = vcombine.high %v982_v18, %v982_v18  ;;  %v365_v29 = vrot.slane %v982_v18, %v347_v53 }
  0x3f   :  { %v355_v26 = vrot.slane %v341_v11, %v347_v53  ;;  %v356_v27 = vcombine.high %v348_v12, %v348_v12  ;;  %v384_v30 = vsel %vm383_vm10, %v348_v12, 0.0  ;;  %v257_v32 = vsel %vm228_vm1, %v203_v50, 0.0 }
  0x40   :  { %v254_v31 = vadd.f32 %v253_v2, %v252_v16  ;;  %v293_v28 = vcombine.high %v277_v59, %v277_v59  ;;  %v325_v33 = vadd.f32 %v324_v10, %v323_v23  ;;  %v328_v17 = vsel %vm228_vm1, %v292_v60, 0.0 }
  0x41   :  { %v357_v34 = vcombine.high %v355_v26, %v355_v26  ;;  %v385_v35 = vsel %vm383_vm10, %v356_v27, 0.0  ;;  %v387_v36 = vsel %vm383_vm10, %v355_v26, 0.0  ;;  %v259_v21 = vsel %vm228_vm1, %v219_v61, 0.0 }
  0x42   :  { %v256_v37 = vadd.f32 %v255_v6, %v254_v31  ;;  %v327_v22 = vadd.f32 %v326_v24, %v325_v33  ;;  %v386_v38 = vadd.f32 %v385_v35, %v384_v30  ;;  %v330_v18 = vsel %vm228_vm1, %v277_v59, 0.0 }
  0x43   :  { %v372_v39 = vrot.slane %v358_v25, %v347_v53  ;;  %v373_v7 = vcombine.high %v365_v29, %v365_v29  ;;  %v389_v8 = vsel %vm383_vm10, %v357_v34, 0.0  ;;  %v332_v13 = vsel %vm228_vm1, %v293_v28, 0.0 }
  0x44   :  { %v258_v40 = vadd.f32 %v257_v32, %v256_v37  ;;  %v329_v41 = vadd.f32 %v328_v17, %v327_v22  ;;  %v388_v9 = vadd.f32 %v387_v36, %v386_v38  ;;  %v391_v42 = vsel %vm383_vm10, %v365_v29, 0.0 }
  0x45   :  { %v374_v44 = vcombine.high %v372_v39, %v372_v39  ;;  %v393_v45 = vsel %vm383_vm10, %v373_v7, 0.0  ;;  %v395_v46 = vsel %vm383_vm10, %v372_v39, 0.0  ;;  %vm69_vm11 = vcmask 1024  }
  0x46   :  { %v260_v43 = vadd.f32 %v259_v21, %v258_v40  ;;  %v331_v14 = vadd.f32 %v330_v18, %v329_v41  ;;  %v390_v15 = vadd.f32 %v389_v8, %v388_v9  ;;  %70 = vst.msk [vmem:[%s1138_s4] sm:$0x3] %vm69_vm11, %v918_v4  ;;  %v115_v4 = vld [vmem:[%s1136_s2 + $0x4] sm:$0xf] }
  0x47   :  { %v397_v48 = vsel %vm383_vm10, %v374_v44, 0.0 }
  0x48   :  { %261 = vadd.xlane.f32.xlu0 %v260_v43  ;;  %v333_v19 = vadd.f32 %v332_v13, %v331_v14  ;;  %v392_v20 = vadd.f32 %v391_v42, %v390_v15 }
  0x4a   :  { %334 = vadd.xlane.f32.xlu1 %v333_v19  ;;  %v394_v47 = vadd.f32 %v393_v45, %v392_v20 }
  0x4c   :  { %v396_v49 = vadd.f32 %v395_v46, %v394_v47 }
  0x4d   :  { %v340_v63 = vld [vmem:[%s1138_s4] sm:$0x3] }
  0x4e   :  { %v398_v50 = vadd.f32 %v397_v48, %v396_v49 }
  0x50   :  { %399 = vadd.xlane.f32.xlu0 %v398_v50 }
  0xc0   :  { %v318_v52 = vpop.xlane.xlu1 %317 }
  0xc1   :  { %v336_v53 = vadd.f32 %v318_v52, %v268_v51 }
  0xc3   :  { %338 = vst.msk [vmem:[%s1137_s3] sm:$0xf] %vm64_vm0, %v336_v53 }
  0xc5   :  { %v245_v55 = vpop.xlane.xlu0 %244 }
  0xc6   :  { %v263_v56 = vadd.f32 %v245_v55, %v114_v54 }
  0xc8   :  { %266 = vst.msk [vmem:[%s1136_s2] sm:$0xf] %vm64_vm0, %v263_v56 }
  0xd1   :  { %v262_v57 = vpop.xlane.xlu0 %261 }
  0xd2   :  { %v264_v59 = vadd.f32 %v262_v57, %v115_v4 }
  0xd3   :  { %v335_v60 = vpop.xlane.xlu1 %334 }
  0xd4   :  { %267 = vst.msk [vmem:[%s1136_s2 + $0x4] sm:$0xf] %vm64_vm0, %v264_v59  ;;  %v337_v62 = vadd.f32 %v335_v60, %v269_v58 }
  0xd6   :  { %339 = vst.msk [vmem:[%s1137_s3 + $0x4] sm:$0xf] %vm64_vm0, %v337_v62 }
  0xd9   :  { %v400_v0 = vpop.xlane.xlu0 %399 }
  0xda   :  { %v401_v3 = vadd.f32 %v400_v0, %v340_v63 }
  0xdc   :  { %403 = vst.msk [vmem:[%s1138_s4] sm:$0x3] %vm69_vm11, %v401_v3 }
  0xdd   :  { %854 = vsyncpa [#allocation3], 1 }
  0xde   :  { %855 = vsyncpa [#allocation5], 1 }

</bundles_post_ra>
